<compile_context>
chip_gen: v7x
topology: tpu7x:2x2x1
jax: 0.10.0
libtpu: 0.0.40
codegen_flags: <defaults>
</compile_context>

<pallas_src>
import functools

import jax
import jax.numpy as jnp
from jax.experimental import pallas as pl
from jax.experimental.pallas import tpu as pltpu

LANE = 128
_NEG_LARGE = float(jnp.finfo(jnp.float32).min)


def _round_up(x, m):
    return (x + m - 1) // m * m


def _channel_attention_kernel(x_ref, w1_ref, w2_ref, o_ref, sum_acc, max_acc, *, hw):
    """One (batch-block, hw-tile) grid step.

    x_ref:   (n_blk, C, hw_tile)  input tile (native dtype)
    w1_ref:  (C, Cr)              shared-MLP weight 1 (resident)
    w2_ref:  (Cr, C)              shared-MLP weight 2 (resident)
    o_ref:   (n_blk, C)           sigmoid(channel attention), written at last HW step
    sum_acc: (n_blk, C, 128) f32  running (lane-folded) sum
    max_acc: (n_blk, C, 128) f32  running (lane-folded) max
    """
    s = pl.program_id(1)
    n_hw_steps = pl.num_programs(1)
    n_blk, c, hw_tile = x_ref.shape

    @pl.when(s == 0)
    def _init():
        sum_acc[...] = jnp.zeros_like(sum_acc)
        max_acc[...] = jnp.full_like(max_acc, _NEG_LARGE)

    x = x_ref[...].astype(jnp.float32)  # upcast per tile (bf16 streaming friendly)

    # Mask lanes past the true spatial extent (ragged last tile / 128-padding).
    if hw % hw_tile != 0:
        col = jax.lax.broadcasted_iota(jnp.int32, (1, 1, hw_tile), 2)
        valid = (s * hw_tile + col) < hw
        x_sum = jnp.where(valid, x, 0.0)
        x_max = jnp.where(valid, x, _NEG_LARGE)
    else:
        x_sum = x
        x_max = x

    # Fold the tile onto 128 lanes with elementwise VPU ops (static lane-aligned
    # slices); the expensive cross-lane reduce is deferred to the final step.
    num_chunks = hw_tile // LANE
    ps = x_sum[..., :LANE]
    pm = x_max[..., :LANE]
    for j in range(1, num_chunks):
        lo = j * LANE
        ps = ps + x_sum[..., lo:lo + LANE]
        pm = jnp.maximum(pm, x_max[..., lo:lo + LANE])

    sum_acc[...] = sum_acc[...] + ps
    max_acc[...] = jnp.maximum(max_acc[...], pm)

    @pl.when(s == n_hw_steps - 1)
    def _finalize():
        # Final cross-lane reduces (once per batch block).
        avg = jnp.sum(sum_acc[...], axis=-1) * (1.0 / float(hw))  # (n_blk, C)
        mx = jnp.max(max_acc[...], axis=-1)                       # (n_blk, C)

        # Shared MLP, fused: one matmul pair over the stacked (2*n_blk, C) rows.
        stacked = jnp.concatenate([avg, mx], axis=0)              # (2*n_blk, C)
        h1 = jnp.dot(stacked, w1_ref[...], preferred_element_type=jnp.float32)
        h1 = jnp.maximum(h1, 0.0)                                 # ReLU
        h2 = jnp.dot(h1, w2_ref[...], preferred_element_type=jnp.float32)
        out = h2[:n_blk, :] + h2[n_blk:, :]                       # avg-branch + max-branch

        o_ref[...] = jax.nn.sigmoid(out).astype(o_ref.dtype)


def channel_attention(x_nchw, w1, w2, *, max_hw_tile=2048, max_n_block=8,
                      input_tile_budget_bytes=8 * 1024 * 1024):
    """x_nchw: (N, C, H, W). w1: (C, C//8), w2: (C//8, C). Returns (N, C, 1, 1)."""
    n, c, h, w = x_nchw.shape
    hw = h * w
    cr = w1.shape[1]
    assert w1.shape == (c, cr) and w2.shape == (cr, c)

    x3 = x_nchw.reshape(n, c, hw)   # stream in native dtype (no f32 upcast here)
    itemsize = jnp.dtype(x3.dtype).itemsize

    # Batch block: N itself when N <= 8, else 8, so the (n_blk, C) output block
    # respects the (8, 128) tiling rule.
    n_blk = n if n <= max_n_block else max_n_block

    # Spatial tile on the lane axis: multiple of 128, as large as the
    # double-buffered-input VMEM budget allows.
    hw_tile = min(_round_up(hw, LANE), _round_up(max_hw_tile, LANE))
    while (2 * n_blk * c * hw_tile * itemsize > input_tile_budget_bytes
           and hw_tile > LANE):
        hw_tile = max(LANE, _round_up(hw_tile // 2, LANE))

    grid = (pl.cdiv(n, n_blk), pl.cdiv(hw, hw_tile))

    kernel = functools.partial(_channel_attention_kernel, hw=hw)

    out = pl.pallas_call(
        kernel,
        out_shape=jax.ShapeDtypeStruct((n, c), x3.dtype),
        grid_spec=pltpu.PrefetchScalarGridSpec(
            num_scalar_prefetch=0,
            grid=grid,
            in_specs=[
                pl.BlockSpec((n_blk, c, hw_tile), lambda b, s: (b, 0, s)),
                pl.BlockSpec((c, cr), lambda b, s: (0, 0)),   # resident weights
                pl.BlockSpec((cr, c), lambda b, s: (0, 0)),
            ],
            out_specs=pl.BlockSpec((n_blk, c), lambda b, s: (b, 0)),
            scratch_shapes=[
                pltpu.VMEM((n_blk, c, LANE), jnp.float32),    # running sum
                pltpu.VMEM((n_blk, c, LANE), jnp.float32),    # running max
            ],
        ),
        compiler_params=pltpu.CompilerParams(
            dimension_semantics=("parallel", "arbitrary"),
            vmem_limit_bytes=32 * 1024 * 1024,
        ),
    )(x3, w1.astype(jnp.float32), w2.astype(jnp.float32))

    return out.reshape(n, c, 1, 1)


def init_params(in_planes, key):
    """Deterministic init of the two bias-free 1x1 conv weights.

    PyTorch shapes: conv1.weight -> (C//8, C, 1, 1), conv2.weight -> (C, C//8, 1, 1).
    Stored here transposed as matmul weights (C_in, C_out).
    """
    cr = in_planes // 8
    k1, k2 = jax.random.split(key)
    b1 = (1.0 / in_planes) ** 0.5
    b2 = (1.0 / cr) ** 0.5
    conv1_w = jax.random.uniform(k1, (cr, in_planes), jnp.float32, -b1, b1)
    conv2_w = jax.random.uniform(k2, (in_planes, cr), jnp.float32, -b2, b2)
    return conv1_w.T, conv2_w.T    # (C, Cr), (Cr, C)


def channel_attention_ref(x_nchw, w1, w2):
    """Pure-JAX reference mirroring the PyTorch forward."""
    n, c, h, w = x_nchw.shape
    x3 = x_nchw.reshape(n, c, h * w).astype(jnp.float32)
    avg = jnp.mean(x3, axis=-1)
    mx = jnp.max(x3, axis=-1)

    def mlp(v):
        return jnp.maximum(v @ w1, 0.0) @ w2

    out = jax.nn.sigmoid(mlp(avg) + mlp(mx))
    return out.reshape(n, c, 1, 1)


if __name__ == "__main__":
    key = jax.random.PRNGKey(0)
    kx, kw = jax.random.split(key)

    # Small shapes consistent with the module (C divisible by ratio=8).
    # HW = 24*24 = 576 is not a multiple of 128 -> exercises the ragged-tile mask.
    N, C, H, W = 2, 16, 24, 24
    x = jax.random.normal(kx, (N, C, H, W), dtype=jnp.float32)
    w1, w2 = init_params(C, kw)

    # Default tiling (single HW step) and forced small tiles (multi-step
    # accumulation across the "arbitrary" HW grid axis).
    y = jax.block_until_ready(channel_attention(x, w1, w2))
    y_tiled = jax.block_until_ready(channel_attention(x, w1, w2, max_hw_tile=128))

    y_ref = channel_attention_ref(x, w1, w2)
    assert y.shape == (N, C, 1, 1)
    assert jnp.allclose(y, y_ref, atol=1e-5, rtol=1e-5)
    assert jnp.allclose(y_tiled, y_ref, atol=1e-5, rtol=1e-5)

    print("KERNEL_OK")
</pallas_src>

<mosaic_0001>
module attributes {stable_mosaic.version = 11 : i64} {
  func.func @_channel_attention_kernel(%arg0: i32, %arg1: i32, %arg2: memref<2x16x640xf32, #tpu.memory_space<vmem>>, %arg3: memref<16x2xf32, #tpu.memory_space<vmem>>, %arg4: memref<2x16xf32, #tpu.memory_space<vmem>>, %arg5: memref<2x16xf32, #tpu.memory_space<vmem>>, %arg6: memref<2x16x128xf32, #tpu.memory_space<vmem>>, %arg7: memref<2x16x128xf32, #tpu.memory_space<vmem>>) attributes {dimension_semantics = [#tpu.dimension_semantics<parallel>, #tpu.dimension_semantics<arbitrary>], iteration_bounds = array<i64: 1, 1>, scalar_prefetch = 0 : i64, scratch_operands = 2 : i64, tpu.core_type = #tpu.core_type<tc>, window_params = [{transform_indices = @transform_0, window_bounds = array<i64: 2, 16, 640>}, {pipeline_mode = #tpu.pipeline_mode<synchronous>, transform_indices = @transform_1, window_bounds = array<i64: 16, 2>}, {pipeline_mode = #tpu.pipeline_mode<synchronous>, transform_indices = @transform_2, window_bounds = array<i64: 2, 16>}, {transform_indices = @transform_3, window_bounds = array<i64: 2, 16>}]} {
    %c0_i32 = arith.constant 0 : i32
    %0 = arith.cmpi eq, %arg1, %c0_i32 : i32
    %1 = arith.extui %0 : i1 to i32
    %c0_i32_0 = arith.constant 0 : i32
    %2 = arith.cmpi ne, %1, %c0_i32_0 : i32
    scf.if %2 {
      %cst_18 = arith.constant 0.000000e+00 : f32
      %45 = vector.broadcast %cst_18 : f32 to vector<2x16x128xf32>
      %c0_19 = arith.constant 0 : index
      %c0_20 = arith.constant 0 : index
      %c0_21 = arith.constant 0 : index
      %46 = vector.load %arg6[%c0_19, %c0_20, %c0_21] : memref<2x16x128xf32, #tpu.memory_space<vmem>>, vector<2x16x128xf32>
      tpu.vector_store %arg6[%c0_19, %c0_20, %c0_21], %45 {strides = array<i32>} : memref<2x16x128xf32, #tpu.memory_space<vmem>>, vector<2x16x128xf32>,
      %cst_22 = arith.constant -3.40282347E+38 : f32
      %47 = vector.broadcast %cst_22 : f32 to vector<2x16x128xf32>
      %c0_23 = arith.constant 0 : index
      %c0_24 = arith.constant 0 : index
      %c0_25 = arith.constant 0 : index
      %48 = vector.load %arg7[%c0_23, %c0_24, %c0_25] : memref<2x16x128xf32, #tpu.memory_space<vmem>>, vector<2x16x128xf32>
      tpu.vector_store %arg7[%c0_23, %c0_24, %c0_25], %47 {strides = array<i32>} : memref<2x16x128xf32, #tpu.memory_space<vmem>>, vector<2x16x128xf32>,
    } else {
    }
    %c0 = arith.constant 0 : index
    %c0_1 = arith.constant 0 : index
    %c0_2 = arith.constant 0 : index
    %3 = vector.load %arg2[%c0, %c0_1, %c0_2] : memref<2x16x640xf32, #tpu.memory_space<vmem>>, vector<2x16x640xf32>
    %4 = tpu.iota {dimensions = array<i32: 2>} : vector<1x1x640xi32>
    %c640_i32 = arith.constant 640 : i32
    %5 = arith.muli %arg1, %c640_i32 : i32
    %6 = vector.broadcast %5 : i32 to vector<1x1x640xi32>
    %7 = arith.addi %6, %4 : vector<1x1x640xi32>
    %c576_i32 = arith.constant 576 : i32
    %8 = vector.broadcast %c576_i32 : i32 to vector<1x1x640xi32>
    %9 = arith.cmpi slt, %7, %8 : vector<1x1x640xi32>
    %cst = arith.constant 0.000000e+00 : f32
    %10 = vector.shape_cast %9 : vector<1x1x640xi1> to vector<1x1x640xi1>
    %11 = vector.broadcast %10 : vector<1x1x640xi1> to vector<2x16x640xi1>
    %12 = vector.broadcast %cst : f32 to vector<2x16x640xf32>
    %13 = arith.select %11, %3, %12 : vector<2x16x640xi1>, vector<2x16x640xf32>
    %cst_3 = arith.constant -3.40282347E+38 : f32
    %14 = vector.shape_cast %9 : vector<1x1x640xi1> to vector<1x1x640xi1>
    %15 = vector.broadcast %14 : vector<1x1x640xi1> to vector<2x16x640xi1>
    %16 = vector.broadcast %cst_3 : f32 to vector<2x16x640xf32>
    %17 = arith.select %15, %3, %16 : vector<2x16x640xi1>, vector<2x16x640xf32>
    %18 = vector.extract_strided_slice %13 {offsets = [0, 0, 0], sizes = [2, 16, 128], strides = [1, 1, 1]} : vector<2x16x640xf32> to vector<2x16x128xf32>
    %19 = vector.extract_strided_slice %17 {offsets = [0, 0, 0], sizes = [2, 16, 128], strides = [1, 1, 1]} : vector<2x16x640xf32> to vector<2x16x128xf32>
    %20 = vector.extract_strided_slice %13 {offsets = [0, 0, 128], sizes = [2, 16, 128], strides = [1, 1, 1]} : vector<2x16x640xf32> to vector<2x16x128xf32>
    %21 = arith.addf %18, %20 : vector<2x16x128xf32>
    %22 = vector.extract_strided_slice %17 {offsets = [0, 0, 128], sizes = [2, 16, 128], strides = [1, 1, 1]} : vector<2x16x640xf32> to vector<2x16x128xf32>
    %23 = arith.maximumf %19, %22 : vector<2x16x128xf32>
    %24 = vector.extract_strided_slice %13 {offsets = [0, 0, 256], sizes = [2, 16, 128], strides = [1, 1, 1]} : vector<2x16x640xf32> to vector<2x16x128xf32>
    %25 = arith.addf %21, %24 : vector<2x16x128xf32>
    %26 = vector.extract_strided_slice %17 {offsets = [0, 0, 256], sizes = [2, 16, 128], strides = [1, 1, 1]} : vector<2x16x640xf32> to vector<2x16x128xf32>
    %27 = arith.maximumf %23, %26 : vector<2x16x128xf32>
    %28 = vector.extract_strided_slice %13 {offsets = [0, 0, 384], sizes = [2, 16, 128], strides = [1, 1, 1]} : vector<2x16x640xf32> to vector<2x16x128xf32>
    %29 = arith.addf %25, %28 : vector<2x16x128xf32>
    %30 = vector.extract_strided_slice %17 {offsets = [0, 0, 384], sizes = [2, 16, 128], strides = [1, 1, 1]} : vector<2x16x640xf32> to vector<2x16x128xf32>
    %31 = arith.maximumf %27, %30 : vector<2x16x128xf32>
    %32 = vector.extract_strided_slice %13 {offsets = [0, 0, 512], sizes = [2, 16, 128], strides = [1, 1, 1]} : vector<2x16x640xf32> to vector<2x16x128xf32>
    %33 = arith.addf %29, %32 : vector<2x16x128xf32>
    %34 = vector.extract_strided_slice %17 {offsets = [0, 0, 512], sizes = [2, 16, 128], strides = [1, 1, 1]} : vector<2x16x640xf32> to vector<2x16x128xf32>
    %35 = arith.maximumf %31, %34 : vector<2x16x128xf32>
    %c0_4 = arith.constant 0 : index
    %c0_5 = arith.constant 0 : index
    %c0_6 = arith.constant 0 : index
    %36 = vector.load %arg6[%c0_4, %c0_5, %c0_6] : memref<2x16x128xf32, #tpu.memory_space<vmem>>, vector<2x16x128xf32>
    %37 = arith.addf %36, %33 : vector<2x16x128xf32>
    %c0_7 = arith.constant 0 : index
    %c0_8 = arith.constant 0 : index
    %c0_9 = arith.constant 0 : index
    %38 = vector.load %arg6[%c0_7, %c0_8, %c0_9] : memref<2x16x128xf32, #tpu.memory_space<vmem>>, vector<2x16x128xf32>
    tpu.vector_store %arg6[%c0_7, %c0_8, %c0_9], %37 {strides = array<i32>} : memref<2x16x128xf32, #tpu.memory_space<vmem>>, vector<2x16x128xf32>,
    %c0_10 = arith.constant 0 : index
    %c0_11 = arith.constant 0 : index
    %c0_12 = arith.constant 0 : index
    %39 = vector.load %arg7[%c0_10, %c0_11, %c0_12] : memref<2x16x128xf32, #tpu.memory_space<vmem>>, vector<2x16x128xf32>
    %40 = arith.maximumf %39, %35 : vector<2x16x128xf32>
    %c0_13 = arith.constant 0 : index
    %c0_14 = arith.constant 0 : index
    %c0_15 = arith.constant 0 : index
    %41 = vector.load %arg7[%c0_13, %c0_14, %c0_15] : memref<2x16x128xf32, #tpu.memory_space<vmem>>, vector<2x16x128xf32>
    tpu.vector_store %arg7[%c0_13, %c0_14, %c0_15], %40 {strides = array<i32>} : memref<2x16x128xf32, #tpu.memory_space<vmem>>, vector<2x16x128xf32>,
    %c0_i32_16 = arith.constant 0 : i32
    %42 = arith.cmpi eq, %arg1, %c0_i32_16 : i32
    %43 = arith.extui %42 : i1 to i32
    %c0_i32_17 = arith.constant 0 : i32
    %44 = arith.cmpi ne, %43, %c0_i32_17 : i32
    scf.if %44 {
      %c0_18 = arith.constant 0 : index
      %c0_19 = arith.constant 0 : index
      %c0_20 = arith.constant 0 : index
      %45 = vector.load %arg6[%c0_18, %c0_19, %c0_20] : memref<2x16x128xf32, #tpu.memory_space<vmem>>, vector<2x16x128xf32>
      %cst_21 = arith.constant dense<0.000000e+00> : vector<2x16xf32>
      %46 = vector.multi_reduction <add>, %45, %cst_21 [2] : vector<2x16x128xf32> to vector<2x16xf32>
      %cst_22 = arith.constant 0.00173611112 : f32
      %47 = vector.broadcast %cst_22 : f32 to vector<2x16xf32>
      %48 = arith.mulf %46, %47 : vector<2x16xf32>
      %c0_23 = arith.constant 0 : index
      %c0_24 = arith.constant 0 : index
      %c0_25 = arith.constant 0 : index
      %49 = vector.load %arg7[%c0_23, %c0_24, %c0_25] : memref<2x16x128xf32, #tpu.memory_space<vmem>>, vector<2x16x128xf32>
      %cst_26 = arith.constant dense<0xFF800000> : vector<2x16xf32>
      %50 = vector.multi_reduction <maximumf>, %49, %cst_26 [2] : vector<2x16x128xf32> to vector<2x16xf32>
      %51 = tpu.concatenate %48, %50 in 0 : vector<2x16xf32>, vector<2x16xf32> -> vector<4x16xf32>
      %c0_27 = arith.constant 0 : index
      %c0_28 = arith.constant 0 : index
      %52 = vector.load %arg3[%c0_27, %c0_28] : memref<16x2xf32, #tpu.memory_space<vmem>>, vector<16x2xf32>
      %cst_29 = arith.constant dense<0.000000e+00> : vector<4x2xf32>
      %53 = tpu.matmul %51, %52, %cst_29 {dimension_numbers = #tpu.dot_dimension_numbers<[1], [0], [0], [1], [0, 0, 1, 1], [], []>} : vector<4x16xf32>, vector<16x2xf32>, vector<4x2xf32> -> vector<4x2xf32>
      %cst_30 = arith.constant 0.000000e+00 : f32
      %54 = vector.broadcast %cst_30 : f32 to vector<4x2xf32>
      %55 = arith.maximumf %53, %54 : vector<4x2xf32>
      %c0_31 = arith.constant 0 : index
      %c0_32 = arith.constant 0 : index
      %56 = vector.load %arg4[%c0_31, %c0_32] : memref<2x16xf32, #tpu.memory_space<vmem>>, vector<2x16xf32>
      %cst_33 = arith.constant dense<0.000000e+00> : vector<4x16xf32>
      %57 = tpu.matmul %55, %56, %cst_33 {dimension_numbers = #tpu.dot_dimension_numbers<[1], [0], [0], [1], [0, 0, 1, 1], [], []>} : vector<4x2xf32>, vector<2x16xf32>, vector<4x16xf32> -> vector<4x16xf32>
      %58 = vector.extract_strided_slice %57 {offsets = [0, 0], sizes = [2, 16], strides = [1, 1]} : vector<4x16xf32> to vector<2x16xf32>
      %59 = vector.extract_strided_slice %57 {offsets = [2, 0], sizes = [2, 16], strides = [1, 1]} : vector<4x16xf32> to vector<2x16xf32>
      %60 = arith.addf %58, %59 : vector<2x16xf32>
      %61 = arith.negf %60 : vector<2x16xf32>
      %62 = math.exp %61 : vector<2x16xf32>
      %cst_34 = arith.constant 1.000000e+00 : f32
      %63 = vector.broadcast %cst_34 : f32 to vector<2x16xf32>
      %64 = arith.addf %63, %62 : vector<2x16xf32>
      %65 = arith.divf %63, %64 : vector<2x16xf32>
      %c0_35 = arith.constant 0 : index
      %c0_36 = arith.constant 0 : index
      %66 = vector.load %arg5[%c0_35, %c0_36] : memref<2x16xf32, #tpu.memory_space<vmem>>, vector<2x16xf32>
      tpu.vector_store %arg5[%c0_35, %c0_36], %65 {strides = array<i32>} : memref<2x16xf32, #tpu.memory_space<vmem>>, vector<2x16xf32>,
    } else {
    }
    return
  }
  func.func @transform_0(%arg0: i32, %arg1: i32) -> (i32, i32, i32) {
    %c0_i32 = arith.constant 0 : i32
    %c0_i32_0 = arith.constant 0 : i32
    return %arg0, %c0_i32, %arg1 : i32, i32, i32
  }
  func.func @transform_1(%arg0: i32, %arg1: i32) -> (i32, i32) {
    %c0_i32 = arith.constant 0 : i32
    %c0_i32_0 = arith.constant 0 : i32
    %c0_i32_1 = arith.constant 0 : i32
    return %c0_i32, %c0_i32_0 : i32, i32
  }
  func.func @transform_2(%arg0: i32, %arg1: i32) -> (i32, i32) {
    %c0_i32 = arith.constant 0 : i32
    %c0_i32_0 = arith.constant 0 : i32
    %c0_i32_1 = arith.constant 0 : i32
    return %c0_i32, %c0_i32_0 : i32, i32
  }
  func.func @transform_3(%arg0: i32, %arg1: i32) -> (i32, i32) {
    %c0_i32 = arith.constant 0 : i32
    %c0_i32_0 = arith.constant 0 : i32
    return %arg0, %c0_i32 : i32, i32
  }
}

</mosaic_0001>

<bundles_post_ra>
// kernel: tpu_custom_call.1
= control target key start
LH: loop header
LB: loop body
LE: loop exit
PB: predicated region body
PF: predicated region fallthrough
CT: control target
= control target key end

     0   :  { %8 = vsyncpa [#allocation5], 0  ;;  %s637_s0 = inlined_call_operand.hbm [shape: f32[2,16,576], index: 0, kind: input, shape index: {}]   ;;  %s638_s1 = inlined_call_operand.vmem [shape: f32[16,2], index: 1, kind: input, shape index: {}]   ;;  %s639_s2 = inlined_call_operand.vmem [shape: f32[2,16], index: 2, kind: input, shape index: {}]   ;;  %s640_s3 = inlined_call_operand.hbm [shape: f32[2,16], index: 3, kind: output, shape index: {}]  }
   0x1   :  { %9 = vsyncpa [#allocation6], 0  ;;  %s535_s12 = smov [#allocation4]   ;;  %s487_s16 = scalar_lea.hbm %s637_s0, 2560 }
   0x2   :  { %s15_s13 = sshll.u32 %s535_s12, 4  ;;  %p488_p0 = scmp.ne.s32.totalorder %s637_s0, %s487_s16  ;;  %s16_s13 = int_to_ptr.vmem [resolvable:$true] %s15_s13 }
   0x3   :  { %p491_p1 = scmp.lt.u32.totalorder %s487_s16, %s637_s0 }
   0x5   :  { %p493_p2 = pnand %p491_p1, %p488_p0 }
   0x7   :  { %496 = shalt.err (!%p493_p2)
}
   0x8   :  { %s497_s21 = scalar_lea.vmem %s16_s13, 2560  ;;  %p502_p4 = scmp.lt.s32.totalorder %s16_s13, %s16_s13 }
   0x9   :  { %p498_p3 = scmp.ne.s32.totalorder %s16_s13, %s497_s21  ;;  %p503_p5 = scmp.lt.s32.totalorder %s497_s21, %s497_s21 }
   0xb   :  { %p504_p6 = por %p503_p5, %p502_p4 }
   0xd   :  { %p505_p7 = pnand %p504_p6, %p498_p3 }
   0xf   :  { %508 = shalt.err (!%p505_p7)
}
  0x10   :  { %s536_s22 = smov 640   ;;  %s537_s23 = smov 40  }
  0x11   :  { %21 = dma.hbm_to_vmem [thread:$0]  %s637_s0, 2560, %s16_s13, [#allocation5], %s536_s22, %s536_s22, %s537_s23  }
  0x12   :  { %531 = dma.done.wait [#allocation5], 2560  }
  0x13   :  { %532 = vsyncadd [#allocation5], 4294964736  ;;  %v61_v0 = vlaneseq  ;;  %v51_v5 = vld [vmem:[#allocation4 + $0x50] sm:$0xff]  ;;  %v52_v6 = vld [vmem:[#allocation4 + $0x58] sm:$0xff]  ;;  %vm539_vm1 = vmmov 0   ;;  %vm229_vm2 = vcmask 130112  }
  0x14   :  { %v53_v7 = vld [vmem:[#allocation4 + $0x60] sm:$0xff]  ;;  %v585_v8 = vld [vmem:[#allocation4 + $0x68] sm:$0xff]  ;;  %v55_v9 = vld [vmem:[#allocation4 + $0x70] sm:$0xff]  ;;  %v131_v10 = vadd.f32 %v52_v6, %v51_v5  ;;  %v135_v12 = vmax.f32 %v51_v5, %v52_v6  ;;  %vm240_vm3 = vcmask 1041409   ;;  %vm265_vm4 = vcmask 1043459   ;;  %s541_s30 = smov [#allocation7]  }
  0x15   :  { %v574_v1 = vand.u32 127, %v61_v0  ;;  %v576_v2 = vshrl.u32 %v61_v0, 7  ;;  %v41_v11 = vld [vmem:[#allocation4] sm:$0xff]  ;;  %v42_v13 = vld [vmem:[#allocation4 + $0x8] sm:$0xff]  ;;  %v43_v14 = vld [vmem:[#allocation4 + $0x10] sm:$0xff]  ;;  %vm268_vm5 = vcmask 1041408  }
  0x16   :  { %v44_v15 = vld [vmem:[#allocation4 + $0x18] sm:$0xff]  ;;  %v139_v16 = vadd.f32 %v131_v10, %v53_v7  ;;  %v45_v17 = vld [vmem:[#allocation4 + $0x20] sm:$0xff]  ;;  %v129_v18 = vadd.f32 %v42_v13, %v41_v11  ;;  %v133_v21 = vmax.f32 %v41_v11, %v42_v13  ;;  %v58_v23 = vld [vmem:[#allocation4 + $0x88] sm:$0xff]  ;;  %v143_v27 = vmax.f32 %v135_v12, %v53_v7  ;;  %s443_s4 = sshll.u32 %s541_s30, 4  ;;  %s444_s4 = int_to_ptr.vmem [resolvable:$true] %s443_s4 }
  0x17   :  { %v579_v3 = vadd.s32 512, %v574_v1  ;;  %v583_v4 = vsub.s32 %v574_v1, %v576_v2  ;;  %v56_v19 = vld [vmem:[#allocation4 + $0x78] sm:$0xff]  ;;  %v57_v20 = vld [vmem:[#allocation4 + $0x80] sm:$0xff]  ;;  %v59_v24 = vld [vmem:[#allocation4 + $0x90] sm:$0xff]  ;;  %v224_v11 = vadd.s32 4294967288, %v574_v1  ;;  %v538_v13 = vmov 0.0|0.0   ;;  %p514_p9 = scmp.lt.s32.totalorder %s444_s4, %s444_s4 }
  0x18   :  { %v60_v25 = vld [vmem:[#allocation4 + $0x98] sm:$0xff]  ;;  %v132_v26 = vadd.f32 %v57_v20, %v56_v19  ;;  %v147_v28 = vadd.f32 %v139_v16, %v585_v8  ;;  %v137_v29 = vadd.f32 %v129_v18, %v43_v14  ;;  %v46_v30 = vld [vmem:[#allocation4 + $0x28] sm:$0xff]  ;;  %v47_v31 = vld [vmem:[#allocation4 + $0x30] sm:$0xff]  ;;  %v141_v33 = vmax.f32 %v133_v21, %v43_v14  ;;  %473 = vmatprep.subr.bf16.mxu0 %v538_v13 }
  0x19   :  { %vm78_vm0 = vcmp.lt.s32.totalorder %v579_v3, 576  ;;  %v48_v32 = vld [vmem:[#allocation4 + $0x38] sm:$0xff]  ;;  %v136_v34 = vmax.f32 %v56_v19, %v57_v20  ;;  %v50_v37 = vld [vmem:[#allocation4 + $0x48] sm:$0xff]  ;;  %v130_v38 = vadd.f32 %v47_v31, %v46_v30  ;;  %v134_v39 = vmax.f32 %v46_v30, %v47_v31  ;;  %v49_v43 = vld [vmem:[#allocation4 + $0x40] sm:$0xff] }
  0x1a   :  { %v103_v22 = vsel %vm78_vm0, %v55_v9, 0.0  ;;  %v93_v35 = vsel %vm78_vm0, %v45_v17, 0.0  ;;  %v140_v36 = vadd.f32 %v132_v26, %v58_v23  ;;  %v145_v41 = vadd.f32 %v137_v29, %v44_v15  ;;  %v270_v3 = vld [vmem:[%s638_s1] sm:$0xff] }
  0x1b   :  { %v155_v40 = vadd.f32 %v147_v28, %v103_v22  ;;  %v108_v42 = vsel %vm78_vm0, %v60_v25, 0.0  ;;  %v113_v44 = vsel %vm78_vm0, %v45_v17, -3.4028235e+38  ;;  %v138_v46 = vadd.f32 %v130_v38, %v48_v32 }
  0x1c   :  { %v148_v45 = vadd.f32 %v140_v36, %v59_v24  ;;  %v142_v47 = vmax.f32 %v134_v39, %v48_v32  ;;  %v149_v48 = vmax.f32 %v141_v33, %v44_v15  ;;  %v153_v49 = vadd.f32 %v145_v41, %v93_v35 }
  0x1d   :  { %196 = vadd.xlane.f32.xlu1 %v155_v40  ;;  %v98_v50 = vsel %vm78_vm0, %v50_v37, 0.0  ;;  %v118_v51 = vsel %vm78_vm0, %v50_v37, -3.4028235e+38  ;;  %v144_v52 = vmax.f32 %v136_v34, %v58_v23  ;;  %v146_v54 = vadd.f32 %v138_v46, %v49_v43  ;;  %v347_v40 = vld [vmem:[%s639_s2] sm:$0x3]  ;;  %s509_s2 = scalar_lea.vmem %s444_s4, 32 }
  0x1e   :  { %v156_v53 = vadd.f32 %v148_v45, %v108_v42  ;;  %v150_v55 = vmax.f32 %v142_v47, %v49_v43  ;;  %v128_v56 = vsel %vm78_vm0, %v60_v25, -3.4028235e+38  ;;  %192 = vadd.xlane.f32.xlu0 %v153_v49  ;;  %v157_v57 = vmax.f32 %v149_v48, %v113_v44  ;;  %p510_p8 = scmp.ne.s32.totalorder %s444_s4, %s509_s2  ;;  %p515_p10 = scmp.lt.s32.totalorder %s509_s2, %s509_s2 }
  0x1f   :  { %v152_v58 = vmax.f32 %v144_v52, %v59_v24  ;;  %v151_v59 = vmax.f32 %v143_v27, %v585_v8  ;;  %v154_v60 = vadd.f32 %v146_v54, %v98_v50  ;;  %v123_v62 = vsel %vm78_vm0, %v55_v9, -3.4028235e+38  ;;  %v271_v9 = vld [vmem:[%s638_s1 + $0x8] sm:$0xff] }
  0x20   :  { %v158_v61 = vmax.f32 %v150_v55, %v118_v51  ;;  %v177_v5 = vmax.f32 %v157_v57, -3.4028235e+38  ;;  %v227_v8 = vsub.s32 %v224_v11, %v576_v2  ;;  %v474_v12 = vpack.c.bf16 %v271_v9, %v270_v3  ;;  %p516_p11 = por %p515_p10, %p514_p9 }
  0x21   :  { %198 = vadd.xlane.f32.xlu1 %v156_v53  ;;  %v160_v63 = vmax.f32 %v152_v58, %v128_v56  ;;  %v159_v6 = vmax.f32 %v151_v59, %v123_v62  ;;  %v540_v14 = vmov 0.0   ;;  %vm272_vm6 = vcmask 130048  }
  0x22   :  { %v178_v0 = vmax.f32 %v158_v61, -3.4028235e+38  ;;  %194 = vadd.xlane.f32.xlu0 %v154_v60  ;;  %475 = vmatpush3.bf16.msra.mxu0 %v474_v12  ;;  %vm348_vm7 = vcmask 15360   ;;  %vm435_vm8 = vcmask 123904   ;;  %p517_p12 = pnand %p516_p11, %p510_p8 }
  0x23   :  { %v180_v7 = vmax.f32 %v160_v63, -3.4028235e+38  ;;  %v179_v10 = vmax.f32 %v159_v6, -3.4028235e+38  ;;  %465 = vmatprep.mubr.msk.f32.mxu0 %vm539_vm1, %v540_v14  ;;  %468 = vmatprep.subr.mxu1 %v540_v14 }
  0x24   :  { %470 = vmatprep.mubr.msk.f32.mxu1 %vm539_vm1, %v540_v14  ;;  %469 = vmatpush3.msk.msra.mxu1 %vm268_vm5, %v347_v40 }
  0x25   :  { %210 = vmax.xlane.f32.xlu1 %v178_v0 }
  0x26   :  { %208 = vmax.xlane.f32.xlu0 %v177_v5 }
  0x29   :  { %214 = vmax.xlane.f32.xlu1 %v180_v7 }
  0x2a   :  { %212 = vmax.xlane.f32.xlu0 %v179_v10 }
  0xaa   :  { %v197_v1 = vpop.xlane.xlu1 %196 }
  0xab   :  { %v193_v15 = vpop.xlane.xlu0 %192  ;;  %v202_v2 = vmul.f32 0.0017361111, %v197_v1 }
  0xac   :  { %v200_v17 = vmul.f32 0.0017361111, %v193_v15 }
  0xad   :  { %v234_v20 = vrot.slane %v202_v2, %v583_v4 }
  0xae   :  { %v199_v16 = vpop.xlane.xlu1 %198  ;;  %v223_v24 = vrot.slane %v200_v17, %v583_v4 }
  0xaf   :  { %v203_v18 = vmul.f32 0.0017361111, %v199_v16  ;;  %v195_v19 = vpop.xlane.xlu0 %194 }
  0xb0   :  { %v201_v22 = vmul.f32 0.0017361111, %v195_v19 }
  0xb1   :  { %v238_v21 = vrot.slane %v203_v18, %v227_v8 }
  0xb2   :  { %v211_v23 = vpop.xlane.xlu1 %210  ;;  %v228_v26 = vrot.slane %v201_v22, %v227_v8 }
  0xb3   :  { %v239_v25 = vsel %vm229_vm2, %v238_v21, %v234_v20  ;;  %v254_v27 = vrot.slane %v211_v23, %v227_v8  ;;  %v209_v28 = vpop.xlane.xlu0 %208 }
  0xb4   :  { %v230_v29 = vsel %vm229_vm2, %v228_v26, %v223_v24  ;;  %v250_v30 = vrot.slane %v209_v28, %v583_v4 }
  0xb5   :  { %v241_v32 = vsel %vm240_vm3, %v239_v25, %v230_v29 }
  0xb6   :  { %v215_v31 = vpop.xlane.xlu1 %214  ;;  %v255_v33 = vsel %vm229_vm2, %v254_v27, %v250_v30 }
  0xb7   :  { %v263_v34 = vrot.slane %v215_v31, %v227_v8  ;;  %v213_v35 = vpop.xlane.xlu0 %212 }
  0xb8   :  { %v259_v36 = vrot.slane %v213_v35, %v583_v4 }
  0xba   :  { %v264_v37 = vsel %vm229_vm2, %v263_v34, %v259_v36 }
  0xbb   :  { %v266_v38 = vsel %vm265_vm4, %v264_v37, %v255_v33 }
  0xbc   :  { %v269_v39 = vsel %vm268_vm5, %v241_v32, %v266_v38 }
  0xbd   :  { %466 = vmatmul.mubr.msk.f32.vlgmr.msra.gmra.mrb[0].mxu0 %vm272_vm6, %v269_v39 }
 0x190   :  { %v342_v41 = vpop.f32.mrb[0].mxu0 }
 0x191   :  { %v346_v42 = vmax.f32 %v342_v41, 0.0  ;;  %v467_v43 = vpop.f32.mrb[1].mxu0 }
 0x193   :  { %471 = vmatmul.mubr.msk.f32.vlgmr.msra.gmra.mrb[0].mxu1 %vm348_vm7, %v346_v42 }
 0x266   :  { %v421_v44 = vpop.f32.mrb[0].mxu1 }
 0x267   :  { %v426_v4 = vrot.slane %v421_v44, 2  ;;  %v472_v45 = vpop.f32.mrb[1].mxu1 }
 0x269   :  { %v428_v46 = vadd.f32 %v426_v4, %v421_v44 }
 0x26b   :  { %v455_v47 = vmul.f32 -1.442695, %v428_v46 }
 0x26d   :  { %483 = vpow2.f32 %v455_v47 }
 0x277   :  { %v484_v48 = vpop.eup %483 }
 0x278   :  { %v432_v49 = vadd.f32 1.0, %v484_v48 }
 0x27a   :  { %485 = vrcp.f32 %v432_v49 }
 0x284   :  { %v486_v50 = vpop.eup %485 }
 0x285   :  { %436 = vst.msk [vmem:[#allocation7] sm:$0x3] %vm435_vm8, %v486_v50 }
 0x286   :  { %520 = shalt.err (!%p517_p12)
}
 0x287   :  { %s521_s7 = scalar_lea.hbm %s640_s3, 32 }
 0x288   :  { %p522_p13 = scmp.ne.s32.totalorder %s640_s3, %s521_s7  ;;  %p525_p0 = scmp.lt.u32.totalorder %s521_s7, %s640_s3 }
 0x28a   :  { %p527_p1 = pnand %p525_p0, %p522_p13 }
 0x28c   :  { %530 = shalt.err (!%p527_p1)
}
 0x28d   :  { %446 = dma.vmem_to_hbm [thread:$0]  %s444_s4, 32, %s640_s3, [#allocation6]  }
 0x28e   :  { %533 = dma.done.wait [#allocation6], 32  }
 0x28f   :  { %534 = vsyncadd [#allocation6], 4294967264 }
 0x290   :  { %450 = vsyncpa [#allocation5], 1 }
 0x291   :  { %451 = vsyncpa [#allocation6], 1 }

</bundles_post_ra>
